<compile_context>
chip_gen: v5e
topology: v5e:2x2
jax: 0.10.0
libtpu: 0.0.40
codegen_flags: <defaults>
</compile_context>

<pallas_src>
import functools

import jax
import jax.numpy as jnp
from jax.experimental import pallas as pl
from jax.experimental.pallas import tpu as pltpu

NEG_SLOPE = 0.01   # F.leaky_relu default
BN_EPS = 1e-5      # nn.BatchNorm1d default

_FUSED_MAX_B = 2048              # largest batch handled as one VMEM block
_DEFAULT_BLOCK_B = 512           # batch tile for the training-size grid path
_VMEM_LIMIT = 32 * 1024 * 1024   # explicit scoped-VMEM limit (safe on v5e/v6e/v7x)


def _leaky_relu(x):
    # Identical to where(x>0, x, slope*x) for slope in (0,1); fewer VPU ops.
    return jnp.maximum(x, NEG_SLOPE * x)


def _mlp(s_norm, action,
         w1_ref, b1_ref, w2s_ref, w2a_ref, b2_ref,
         w3_ref, b3_ref, w4_ref, b4_ref):
    """Shared MLP body: fcs1 -> fc2 (split state/action) -> fc3 -> fc4 head."""
    # fcs1: bf16 MXU operands, f32 accumulation.
    xs = jnp.dot(s_norm.astype(jnp.bfloat16), w1_ref[...],
                 preferred_element_type=jnp.float32) + b1_ref[...]
    xs = _leaky_relu(xs)
    # TODO(synk): on v6e/v7x keep xs/h2 in bf16 through the leaky_relu to halve
    # vreg pressure; kept f32 so the same kernel is efficient on v5e (no bf16
    # VALU) and numerically closer to the f32 PyTorch module.

    # fc2 on concat([xs, action]): xs part on the MXU; tiny action part (K=2,
    # >97% MXU padding) as broadcast FMAs on the VPU — free under the matmul.
    h2 = jnp.dot(xs.astype(jnp.bfloat16), w2s_ref[...],
                 preferred_element_type=jnp.float32) + b2_ref[...]
    a = action.astype(jnp.float32)
    for i in range(a.shape[1]):          # static tiny loop over action dims
        h2 = h2 + a[:, i:i + 1] * w2a_ref[i:i + 1, :]
    h2 = _leaky_relu(h2)

    # fc3
    h3 = jnp.dot(h2.astype(jnp.bfloat16), w3_ref[...],
                 preferred_element_type=jnp.float32) + b3_ref[...]
    h3 = _leaky_relu(h3)

    # fc4 head (N=1): VPU multiply + lane reduce instead of a 1/128-wide MXU
    # matmul. w4 is a lane-dense (1, 128) f32 row, b4 is a (1, 1) f32.
    return jnp.sum(h3 * w4_ref[...], axis=-1, keepdims=True) + b4_ref[...]


# --------------------------------------------------------------------------
# Kernel 1: fused single-block critic, one independent evaluation per grid
# step (per-slice BN stats). Used for small/medium batches and for stacking
# several critic evaluations (Q(s,a), Q(s',a'), ...) into one dispatch.
# --------------------------------------------------------------------------
def critic_fused_kernel(state_ref, action_ref, gamma_ref, beta_ref,
                        w1_ref, b1_ref, w2s_ref, w2a_ref, b2_ref,
                        w3_ref, b3_ref, w4_ref, b4_ref, out_ref):
    s = state_ref[0].astype(jnp.float32)          # (B, S)
    inv_b = 1.0 / s.shape[0]

    # BatchNorm1d (training mode), fused statistics over this slice's batch.
    mean = jnp.sum(s, axis=0, keepdims=True) * inv_b
    mean_sq = jnp.sum(s * s, axis=0, keepdims=True) * inv_b
    var = jnp.maximum(mean_sq - mean * mean, 0.0)   # clamp f32 cancellation
    scale = gamma_ref[...] * jax.lax.rsqrt(var + BN_EPS)
    shift = beta_ref[...] - mean * scale
    s_norm = s * scale + shift

    out_ref[0] = _mlp(s_norm, action_ref[0],
                      w1_ref, b1_ref, w2s_ref, w2a_ref, b2_ref,
                      w3_ref, b3_ref, w4_ref, b4_ref)


# --------------------------------------------------------------------------
# Kernels 2+3: two-phase path for training batch sizes.
#   Pass 1: accumulate full-batch sum / sum-of-squares over batch tiles into
#           a resident output block, finalize [scale; shift] on the last step.
#   Pass 2: batch-tiled BN-apply + MLP, batch axis 'parallel' (v7x megacore).
# --------------------------------------------------------------------------
def bn_stats_kernel(gamma_ref, beta_ref, state_ref, stats_ref, *, inv_b):
    i = pl.program_id(0)

    @pl.when(i == 0)
    def _():
        stats_ref[...] = jnp.zeros_like(stats_ref)

    s = state_ref[...].astype(jnp.float32)
    stats_ref[0:1, :] += jnp.sum(s, axis=0, keepdims=True)
    stats_ref[1:2, :] += jnp.sum(s * s, axis=0, keepdims=True)

    @pl.when(i == pl.num_programs(0) - 1)
    def _():
        mean = stats_ref[0:1, :] * inv_b
        var = jnp.maximum(stats_ref[1:2, :] * inv_b - mean * mean, 0.0)
        scale = gamma_ref[...] * jax.lax.rsqrt(var + BN_EPS)
        stats_ref[0:1, :] = scale
        stats_ref[1:2, :] = beta_ref[...] - mean * scale


def critic_tiled_kernel(stats_ref, state_ref, action_ref,
                        w1_ref, b1_ref, w2s_ref, w2a_ref, b2_ref,
                        w3_ref, b3_ref, w4_ref, b4_ref, out_ref):
    s = state_ref[...].astype(jnp.float32)
    s_norm = s * stats_ref[0:1, :] + stats_ref[1:2, :]
    out_ref[...] = _mlp(s_norm, action_ref[...],
                        w1_ref, b1_ref, w2s_ref, w2a_ref, b2_ref,
                        w3_ref, b3_ref, w4_ref, b4_ref)


# --------------------------------------------------------------------------
# Wrappers
# --------------------------------------------------------------------------
def _replicated(shape):
    """Full-extent block that maps to block (0, ..., 0) on every grid step, so
    the array is DMA'd once and stays VMEM-resident across the grid."""
    n = len(shape)
    return pl.BlockSpec(tuple(shape), lambda *_: (0,) * n)


_WEIGHT_KEYS = ("w1", "b1", "w2s", "w2a", "b2", "w3", "b3", "w4", "b4")


def _weight_args(params):
    return tuple(params[k] for k in _WEIGHT_KEYS)


def _weight_specs(params):
    return [_replicated(params[k].shape) for k in _WEIGHT_KEYS]


def critic_forward_stacked(states, actions, params):
    """Q-values for E independent critic evaluations in ONE pallas_call.

    states: (E, B, S), actions: (E, B, A) -> (E, B, 1).
    BatchNorm statistics are computed per slice e (identical to E separate
    PyTorch forward() calls). The E axis is a 'parallel' grid dimension.
    """
    E, B, S = states.shape
    A = actions.shape[-1]
    assert B <= _FUSED_MAX_B, "per-slice batch too large; use critic_forward"

    in_specs = [
        pl.BlockSpec((1, B, S), lambda e: (e, 0, 0)),
        pl.BlockSpec((1, B, A), lambda e: (e, 0, 0)),
        _replicated(params["gamma"].shape),
        _replicated(params["beta"].shape),
    ] + _weight_specs(params)
    return pl.pallas_call(
        critic_fused_kernel,
        out_shape=jax.ShapeDtypeStruct((E, B, 1), jnp.float32),
        grid=(E,),
        in_specs=in_specs,
        out_specs=pl.BlockSpec((1, B, 1), lambda e: (e, 0, 0)),
        compiler_params=pltpu.CompilerParams(
            dimension_semantics=("parallel",),
            vmem_limit_bytes=_VMEM_LIMIT),
    )(states, actions, params["gamma"], params["beta"], *_weight_args(params))


def critic_forward(state, action, params, *, block_b=_DEFAULT_BLOCK_B,
                   force_tiled=False):
    """Q(state, action).

    B <= 2048: single fused kernel, one dispatch (the dominant cost at RL
    act()-sized batches). Larger B: two-phase BN (stats accumulator grid,
    'arbitrary') followed by a batch-tiled MLP grid ('parallel').
    """
    B, S = state.shape
    A = action.shape[-1]

    if B <= _FUSED_MAX_B and not force_tiled:
        return critic_forward_stacked(state[None], action[None], params)[0]

    assert block_b % 8 == 0, "batch tile must be a multiple of 8 (f32 sublanes)"
    n_b = (B + block_b - 1) // block_b
    b_pad = n_b * block_b
    if b_pad != B:
        # Zero-pad rows: zeros don't perturb the sums (we divide by real B),
        # and the padded Q-rows are sliced off below.
        state = jnp.pad(state, ((0, b_pad - B), (0, 0)))
        action = jnp.pad(action, ((0, b_pad - B), (0, 0)))

    # Pass 1: full-batch BN statistics -> [scale; shift] (2, S).
    stats = pl.pallas_call(
        functools.partial(bn_stats_kernel, inv_b=1.0 / B),
        out_shape=jax.ShapeDtypeStruct((2, S), jnp.float32),
        grid=(n_b,),
        in_specs=[_replicated(params["gamma"].shape),
                  _replicated(params["beta"].shape),
                  pl.BlockSpec((block_b, S), lambda i: (i, 0))],
        out_specs=pl.BlockSpec((2, S), lambda i: (0, 0)),
        compiler_params=pltpu.CompilerParams(
            dimension_semantics=("arbitrary",),   # sequential accumulation
            vmem_limit_bytes=_VMEM_LIMIT),
    )(params["gamma"], params["beta"], state)

    # Pass 2: batch-tiled BN-apply + MLP.
    in_specs = [
        _replicated((2, S)),
        pl.BlockSpec((block_b, S), lambda i: (i, 0)),
        pl.BlockSpec((block_b, A), lambda i: (i, 0)),
    ] + _weight_specs(params)
    q = pl.pallas_call(
        critic_tiled_kernel,
        out_shape=jax.ShapeDtypeStruct((b_pad, 1), jnp.float32),
        grid=(n_b,),
        in_specs=in_specs,
        # NOTE: (block_b, 1) output lowers to a masked store; negligible here.
        # TODO(synk): switch to a lane-dense (1, block_b) output layout if the
        # store tail ever shows up in the bundle.
        out_specs=pl.BlockSpec((block_b, 1), lambda i: (i, 0)),
        compiler_params=pltpu.CompilerParams(
            dimension_semantics=("parallel",),    # v7x: shard over both TCs
            vmem_limit_bytes=_VMEM_LIMIT),
    )(stats, state, action, *_weight_args(params))
    return q[:B]


# --------------------------------------------------------------------------
# Parameters & reference
# --------------------------------------------------------------------------
def init_critic_params(key, state_size, action_size,
                       fcs1_units=256, fc2_units=256, fc3_units=128):
    """Deterministic parameter init mirroring the PyTorch module's shapes/ranges.

    MXU weights are stored pre-transposed as (in_features, out_features) in
    bfloat16; VPU-path weights (w2a, w4) and all biases stay float32.
    """
    ks = jax.random.split(key, 9)

    def uniform(k, shape, lim):
        return jax.random.uniform(k, shape, jnp.float32, -lim, lim)

    # hidden_init uses lim = 1/sqrt(fan_in) with fan_in = weight.size(0)
    # (== out_features in the reference code); reproduced literally.
    w1 = uniform(ks[0], (state_size, fcs1_units), 1.0 / jnp.sqrt(fcs1_units))
    b1 = uniform(ks[1], (1, fcs1_units), 1.0 / jnp.sqrt(state_size))
    w2s = uniform(ks[2], (fcs1_units, fc2_units), 1.0 / jnp.sqrt(fc2_units))
    w2a = uniform(ks[3], (action_size, fc2_units), 1.0 / jnp.sqrt(fc2_units))
    b2 = uniform(ks[4], (1, fc2_units), 1.0 / jnp.sqrt(fcs1_units + action_size))
    w3 = uniform(ks[5], (fc2_units, fc3_units), 1.0 / jnp.sqrt(fc3_units))
    b3 = uniform(ks[6], (1, fc3_units), 1.0 / jnp.sqrt(fc2_units))
    w4 = uniform(ks[7], (1, fc3_units), 0.003)              # lane-dense row
    b4 = uniform(ks[8], (1, 1), 1.0 / jnp.sqrt(fc3_units))  # (1,1) f32

    gamma = jnp.ones((1, state_size), jnp.float32)   # BatchNorm1d weight
    beta = jnp.zeros((1, state_size), jnp.float32)   # BatchNorm1d bias

    return dict(
        gamma=gamma, beta=beta,
        w1=w1.astype(jnp.bfloat16), b1=b1,
        w2s=w2s.astype(jnp.bfloat16), w2a=w2a, b2=b2,
        w3=w3.astype(jnp.bfloat16), b3=b3,
        w4=w4, b4=b4,
    )


def critic_forward_ref(state, action, params):
    """Pure-JAX reference (f32 math, same stored weights) for correctness."""
    s = state.astype(jnp.float32)
    mean = jnp.mean(s, axis=0, keepdims=True)
    var = jnp.mean((s - mean) ** 2, axis=0, keepdims=True)
    s = (s - mean) / jnp.sqrt(var + BN_EPS) * params["gamma"] + params["beta"]
    w1 = params["w1"].astype(jnp.float32)
    w2s = params["w2s"].astype(jnp.float32)
    w3 = params["w3"].astype(jnp.float32)
    xs = _leaky_relu(s @ w1 + params["b1"])
    h2 = _leaky_relu(xs @ w2s + action @ params["w2a"] + params["b2"])
    h3 = _leaky_relu(h2 @ w3 + params["b3"])
    return jnp.sum(h3 * params["w4"], axis=-1, keepdims=True) + params["b4"]


if __name__ == "__main__":
    # Small shapes consistent with a DDPG critic (e.g. Tennis env).
    B, STATE_SIZE, ACTION_SIZE = 8, 24, 2

    key = jax.random.PRNGKey(0)
    k_s, k_a, k_s2, k_a2, k_p, k_sb, k_ab = jax.random.split(key, 7)
    params = init_critic_params(k_p, STATE_SIZE, ACTION_SIZE)

    # 1) Small-batch single-dispatch path (act()-style call).
    state = jax.random.normal(k_s, (B, STATE_SIZE), jnp.float32)
    action = jax.random.uniform(k_a, (B, ACTION_SIZE), jnp.float32, -1.0, 1.0)
    q = jax.block_until_ready(critic_forward(state, action, params))
    q_ref = critic_forward_ref(state, action, params)
    assert q.shape == (B, 1)
    # bf16 MXU operands (weights + activations), f32 accumulation -> 2e-2 tol.
    assert jnp.allclose(q, q_ref, atol=2e-2, rtol=2e-2), (q, q_ref)

    # 2) Stacked evaluations: Q(s,a) and Q(s',a') in ONE pallas_call with
    #    per-slice BN statistics (dispatch amortization).
    state2 = jax.random.normal(k_s2, (B, STATE_SIZE), jnp.float32)
    action2 = jax.random.uniform(k_a2, (B, ACTION_SIZE), jnp.float32, -1.0, 1.0)
    states = jnp.stack([state, state2])
    actions = jnp.stack([action, action2])
    q_stk = jax.block_until_ready(critic_forward_stacked(states, actions, params))
    q_ref2 = critic_forward_ref(state2, action2, params)
    assert q_stk.shape == (2, B, 1)
    assert jnp.allclose(q_stk[0], q_ref, atol=2e-2, rtol=2e-2)
    assert jnp.allclose(q_stk[1], q_ref2, atol=2e-2, rtol=2e-2)

    # 3) Training-batch tiled path: two-phase BN stats + parallel batch grid
    #    (batch deliberately not a multiple of the tile to exercise padding).
    BT = 250
    state_b = jax.random.normal(k_sb, (BT, STATE_SIZE), jnp.float32)
    action_b = jax.random.uniform(k_ab, (BT, ACTION_SIZE), jnp.float32, -1.0, 1.0)
    q_big = jax.block_until_ready(
        critic_forward(state_b, action_b, params, block_b=128, force_tiled=True))
    q_big_ref = critic_forward_ref(state_b, action_b, params)
    assert q_big.shape == (BT, 1)
    assert jnp.allclose(q_big, q_big_ref, atol=2e-2, rtol=2e-2)

    print("KERNEL_OK")
</pallas_src>

<mosaic_0001>
module attributes {stable_mosaic.version = 11 : i64} {
  func.func @critic_fused_kernel(%arg0: i32, %arg1: memref<1x8x24xf32, #tpu.memory_space<vmem>>, %arg2: memref<1x8x2xf32, #tpu.memory_space<vmem>>, %arg3: memref<1x24xf32, #tpu.memory_space<vmem>>, %arg4: memref<1x24xf32, #tpu.memory_space<vmem>>, %arg5: memref<24x256xbf16, #tpu.memory_space<vmem>>, %arg6: memref<1x256xf32, #tpu.memory_space<vmem>>, %arg7: memref<256x256xbf16, #tpu.memory_space<vmem>>, %arg8: memref<2x256xf32, #tpu.memory_space<vmem>>, %arg9: memref<1x256xf32, #tpu.memory_space<vmem>>, %arg10: memref<256x128xbf16, #tpu.memory_space<vmem>>, %arg11: memref<1x128xf32, #tpu.memory_space<vmem>>, %arg12: memref<1x128xf32, #tpu.memory_space<vmem>>, %arg13: memref<1x1xf32, #tpu.memory_space<vmem>>, %arg14: memref<1x8x1xf32, #tpu.memory_space<vmem>>) attributes {dimension_semantics = [#tpu.dimension_semantics<parallel>], iteration_bounds = array<i64: 1>, scalar_prefetch = 0 : i64, scratch_operands = 0 : i64, tpu.core_type = #tpu.core_type<tc>, window_params = [{transform_indices = @transform_0, window_bounds = array<i64: 1, 8, 24>}, {transform_indices = @transform_1, window_bounds = array<i64: 1, 8, 2>}, {pipeline_mode = #tpu.pipeline_mode<synchronous>, transform_indices = @transform_2, window_bounds = array<i64: 1, 24>}, {pipeline_mode = #tpu.pipeline_mode<synchronous>, transform_indices = @transform_3, window_bounds = array<i64: 1, 24>}, {pipeline_mode = #tpu.pipeline_mode<synchronous>, transform_indices = @transform_4, window_bounds = array<i64: 24, 256>}, {pipeline_mode = #tpu.pipeline_mode<synchronous>, transform_indices = @transform_5, window_bounds = array<i64: 1, 256>}, {pipeline_mode = #tpu.pipeline_mode<synchronous>, transform_indices = @transform_6, window_bounds = array<i64: 256, 256>}, {pipeline_mode = #tpu.pipeline_mode<synchronous>, transform_indices = @transform_7, window_bounds = array<i64: 2, 256>}, {pipeline_mode = #tpu.pipeline_mode<synchronous>, transform_indices = @transform_8, window_bounds = array<i64: 1, 256>}, {pipeline_mode = #tpu.pipeline_mode<synchronous>, transform_indices = @transform_9, window_bounds = array<i64: 256, 128>}, {pipeline_mode = #tpu.pipeline_mode<synchronous>, transform_indices = @transform_10, window_bounds = array<i64: 1, 128>}, {pipeline_mode = #tpu.pipeline_mode<synchronous>, transform_indices = @transform_11, window_bounds = array<i64: 1, 128>}, {pipeline_mode = #tpu.pipeline_mode<synchronous>, transform_indices = @transform_12, window_bounds = array<i64: 1, 1>}, {transform_indices = @transform_13, window_bounds = array<i64: 1, 8, 1>}]} {
    %c0 = arith.constant 0 : index
    %c0_0 = arith.constant 0 : index
    %c0_1 = arith.constant 0 : index
    %0 = vector.load %arg1[%c0, %c0_0, %c0_1] : memref<1x8x24xf32, #tpu.memory_space<vmem>>, vector<1x8x24xf32>
    %1 = vector.shape_cast %0 : vector<1x8x24xf32> to vector<8x24xf32>
    %cst = arith.constant dense<0.000000e+00> : vector<24xf32>
    %2 = vector.multi_reduction <add>, %1, %cst [0] : vector<8x24xf32> to vector<24xf32>
    %3 = vector.shape_cast %2 : vector<24xf32> to vector<1x24xf32>
    %cst_2 = arith.constant 1.250000e-01 : f32
    %4 = vector.broadcast %cst_2 : f32 to vector<1x24xf32>
    %5 = arith.mulf %3, %4 : vector<1x24xf32>
    %6 = arith.mulf %1, %1 : vector<8x24xf32>
    %cst_3 = arith.constant dense<0.000000e+00> : vector<24xf32>
    %7 = vector.multi_reduction <add>, %6, %cst_3 [0] : vector<8x24xf32> to vector<24xf32>
    %8 = vector.shape_cast %7 : vector<24xf32> to vector<1x24xf32>
    %cst_4 = arith.constant 1.250000e-01 : f32
    %9 = vector.broadcast %cst_4 : f32 to vector<1x24xf32>
    %10 = arith.mulf %8, %9 : vector<1x24xf32>
    %11 = arith.mulf %5, %5 : vector<1x24xf32>
    %12 = arith.subf %10, %11 : vector<1x24xf32>
    %cst_5 = arith.constant 0.000000e+00 : f32
    %13 = vector.broadcast %cst_5 : f32 to vector<1x24xf32>
    %14 = arith.maximumf %12, %13 : vector<1x24xf32>
    %c0_6 = arith.constant 0 : index
    %c0_7 = arith.constant 0 : index
    %15 = vector.load %arg3[%c0_6, %c0_7] : memref<1x24xf32, #tpu.memory_space<vmem>>, vector<1x24xf32>
    %cst_8 = arith.constant 9.99999974E-6 : f32
    %16 = vector.broadcast %cst_8 : f32 to vector<1x24xf32>
    %17 = arith.addf %14, %16 : vector<1x24xf32>
    %18 = math.rsqrt %17 : vector<1x24xf32>
    %19 = arith.mulf %15, %18 : vector<1x24xf32>
    %c0_9 = arith.constant 0 : index
    %c0_10 = arith.constant 0 : index
    %20 = vector.load %arg4[%c0_9, %c0_10] : memref<1x24xf32, #tpu.memory_space<vmem>>, vector<1x24xf32>
    %21 = arith.mulf %5, %19 : vector<1x24xf32>
    %22 = arith.subf %20, %21 : vector<1x24xf32>
    %23 = vector.broadcast %19 : vector<1x24xf32> to vector<8x24xf32>
    %24 = arith.mulf %1, %23 : vector<8x24xf32>
    %25 = vector.broadcast %22 : vector<1x24xf32> to vector<8x24xf32>
    %26 = arith.addf %24, %25 : vector<8x24xf32>
    %c0_11 = arith.constant 0 : index
    %c0_12 = arith.constant 0 : index
    %c0_13 = arith.constant 0 : index
    %27 = vector.load %arg2[%c0_11, %c0_12, %c0_13] : memref<1x8x2xf32, #tpu.memory_space<vmem>>, vector<1x8x2xf32>
    %28 = vector.shape_cast %27 : vector<1x8x2xf32> to vector<8x2xf32>
    %29 = arith.truncf %26 : vector<8x24xf32> to vector<8x24xbf16>
    %c0_14 = arith.constant 0 : index
    %c0_15 = arith.constant 0 : index
    %30 = vector.load %arg5[%c0_14, %c0_15] : memref<24x256xbf16, #tpu.memory_space<vmem>>, vector<24x256xbf16>
    %cst_16 = arith.constant dense<0.000000e+00> : vector<8x256xf32>
    %31 = tpu.matmul %29, %30, %cst_16 {dimension_numbers = #tpu.dot_dimension_numbers<[1], [0], [0], [1], [0, 0, 1, 1], [], []>} : vector<8x24xbf16>, vector<24x256xbf16>, vector<8x256xf32> -> vector<8x256xf32>
    %c0_17 = arith.constant 0 : index
    %c0_18 = arith.constant 0 : index
    %32 = vector.load %arg6[%c0_17, %c0_18] : memref<1x256xf32, #tpu.memory_space<vmem>>, vector<1x256xf32>
    %33 = vector.broadcast %32 : vector<1x256xf32> to vector<8x256xf32>
    %34 = arith.addf %31, %33 : vector<8x256xf32>
    %cst_19 = arith.constant 0.00999999977 : f32
    %35 = vector.broadcast %cst_19 : f32 to vector<8x256xf32>
    %36 = arith.mulf %35, %34 : vector<8x256xf32>
    %37 = arith.maximumf %34, %36 : vector<8x256xf32>
    %38 = arith.truncf %37 : vector<8x256xf32> to vector<8x256xbf16>
    %c0_20 = arith.constant 0 : index
    %c0_21 = arith.constant 0 : index
    %39 = vector.load %arg7[%c0_20, %c0_21] : memref<256x256xbf16, #tpu.memory_space<vmem>>, vector<256x256xbf16>
    %cst_22 = arith.constant dense<0.000000e+00> : vector<8x256xf32>
    %40 = tpu.matmul %38, %39, %cst_22 {dimension_numbers = #tpu.dot_dimension_numbers<[1], [0], [0], [1], [0, 0, 1, 1], [], []>} : vector<8x256xbf16>, vector<256x256xbf16>, vector<8x256xf32> -> vector<8x256xf32>
    %c0_23 = arith.constant 0 : index
    %c0_24 = arith.constant 0 : index
    %41 = vector.load %arg9[%c0_23, %c0_24] : memref<1x256xf32, #tpu.memory_space<vmem>>, vector<1x256xf32>
    %42 = vector.broadcast %41 : vector<1x256xf32> to vector<8x256xf32>
    %43 = arith.addf %40, %42 : vector<8x256xf32>
    %44 = vector.extract_strided_slice %28 {offsets = [0, 0], sizes = [8, 1], strides = [1, 1]} : vector<8x2xf32> to vector<8x1xf32>
    %c0_25 = arith.constant 0 : index
    %c0_26 = arith.constant 0 : index
    %45 = vector.load %arg8[%c0_25, %c0_26] : memref<2x256xf32, #tpu.memory_space<vmem>>, vector<1x256xf32>
    %46 = vector.broadcast %44 : vector<8x1xf32> to vector<8x256xf32>
    %47 = vector.broadcast %45 : vector<1x256xf32> to vector<8x256xf32>
    %48 = arith.mulf %46, %47 : vector<8x256xf32>
    %49 = arith.addf %43, %48 : vector<8x256xf32>
    %50 = vector.extract_strided_slice %28 {offsets = [0, 1], sizes = [8, 1], strides = [1, 1]} : vector<8x2xf32> to vector<8x1xf32>
    %c1 = arith.constant 1 : index
    %c0_27 = arith.constant 0 : index
    %51 = vector.load %arg8[%c1, %c0_27] : memref<2x256xf32, #tpu.memory_space<vmem>>, vector<1x256xf32>
    %52 = vector.broadcast %50 : vector<8x1xf32> to vector<8x256xf32>
    %53 = vector.broadcast %51 : vector<1x256xf32> to vector<8x256xf32>
    %54 = arith.mulf %52, %53 : vector<8x256xf32>
    %55 = arith.addf %49, %54 : vector<8x256xf32>
    %cst_28 = arith.constant 0.00999999977 : f32
    %56 = vector.broadcast %cst_28 : f32 to vector<8x256xf32>
    %57 = arith.mulf %56, %55 : vector<8x256xf32>
    %58 = arith.maximumf %55, %57 : vector<8x256xf32>
    %59 = arith.truncf %58 : vector<8x256xf32> to vector<8x256xbf16>
    %c0_29 = arith.constant 0 : index
    %c0_30 = arith.constant 0 : index
    %60 = vector.load %arg10[%c0_29, %c0_30] : memref<256x128xbf16, #tpu.memory_space<vmem>>, vector<256x128xbf16>
    %cst_31 = arith.constant dense<0.000000e+00> : vector<8x128xf32>
    %61 = tpu.matmul %59, %60, %cst_31 {dimension_numbers = #tpu.dot_dimension_numbers<[1], [0], [0], [1], [0, 0, 1, 1], [], []>} : vector<8x256xbf16>, vector<256x128xbf16>, vector<8x128xf32> -> vector<8x128xf32>
    %c0_32 = arith.constant 0 : index
    %c0_33 = arith.constant 0 : index
    %62 = vector.load %arg11[%c0_32, %c0_33] : memref<1x128xf32, #tpu.memory_space<vmem>>, vector<1x128xf32>
    %63 = vector.broadcast %62 : vector<1x128xf32> to vector<8x128xf32>
    %64 = arith.addf %61, %63 : vector<8x128xf32>
    %cst_34 = arith.constant 0.00999999977 : f32
    %65 = vector.broadcast %cst_34 : f32 to vector<8x128xf32>
    %66 = arith.mulf %65, %64 : vector<8x128xf32>
    %67 = arith.maximumf %64, %66 : vector<8x128xf32>
    %c0_35 = arith.constant 0 : index
    %c0_36 = arith.constant 0 : index
    %68 = vector.load %arg12[%c0_35, %c0_36] : memref<1x128xf32, #tpu.memory_space<vmem>>, vector<1x128xf32>
    %69 = vector.broadcast %68 : vector<1x128xf32> to vector<8x128xf32>
    %70 = arith.mulf %67, %69 : vector<8x128xf32>
    %cst_37 = arith.constant dense<0.000000e+00> : vector<8xf32>
    %71 = vector.multi_reduction <add>, %70, %cst_37 [1] : vector<8x128xf32> to vector<8xf32>
    %72 = vector.shape_cast %71 : vector<8xf32> to vector<8x1xf32>
    %c0_38 = arith.constant 0 : index
    %c0_39 = arith.constant 0 : index
    %73 = vector.load %arg13[%c0_38, %c0_39] : memref<1x1xf32, #tpu.memory_space<vmem>>, vector<1x1xf32>
    %74 = vector.broadcast %73 : vector<1x1xf32> to vector<8x1xf32>
    %75 = arith.addf %72, %74 : vector<8x1xf32>
    %c0_40 = arith.constant 0 : index
    %c0_41 = arith.constant 0 : index
    %c0_42 = arith.constant 0 : index
    %76 = vector.load %arg14[%c0_40, %c0_41, %c0_42] : memref<1x8x1xf32, #tpu.memory_space<vmem>>, vector<1x8x1xf32>
    %77 = vector.shape_cast %76 : vector<1x8x1xf32> to vector<8x1xf32>
    %78 = vector.shape_cast %75 : vector<8x1xf32> to vector<1x8x1xf32>
    tpu.vector_store %arg14[%c0_40, %c0_41, %c0_42], %78 {strides = array<i32>} : memref<1x8x1xf32, #tpu.memory_space<vmem>>, vector<1x8x1xf32>,
    return
  }
  func.func @transform_0(%arg0: i32) -> (i32, i32, i32) {
    %c0_i32 = arith.constant 0 : i32
    %c0_i32_0 = arith.constant 0 : i32
    %c0_i32_1 = arith.constant 0 : i32
    return %arg0, %c0_i32, %c0_i32_0 : i32, i32, i32
  }
  func.func @transform_1(%arg0: i32) -> (i32, i32, i32) {
    %c0_i32 = arith.constant 0 : i32
    %c0_i32_0 = arith.constant 0 : i32
    %c0_i32_1 = arith.constant 0 : i32
    return %arg0, %c0_i32, %c0_i32_0 : i32, i32, i32
  }
  func.func @transform_2(%arg0: i32) -> (i32, i32) {
    %c0_i32 = arith.constant 0 : i32
    %c0_i32_0 = arith.constant 0 : i32
    %c0_i32_1 = arith.constant 0 : i32
    return %c0_i32, %c0_i32_0 : i32, i32
  }
  func.func @transform_3(%arg0: i32) -> (i32, i32) {
    %c0_i32 = arith.constant 0 : i32
    %c0_i32_0 = arith.constant 0 : i32
    %c0_i32_1 = arith.constant 0 : i32
    return %c0_i32, %c0_i32_0 : i32, i32
  }
  func.func @transform_4(%arg0: i32) -> (i32, i32) {
    %c0_i32 = arith.constant 0 : i32
    %c0_i32_0 = arith.constant 0 : i32
    %c0_i32_1 = arith.constant 0 : i32
    return %c0_i32, %c0_i32_0 : i32, i32
  }
  func.func @transform_5(%arg0: i32) -> (i32, i32) {
    %c0_i32 = arith.constant 0 : i32
    %c0_i32_0 = arith.constant 0 : i32
    %c0_i32_1 = arith.constant 0 : i32
    return %c0_i32, %c0_i32_0 : i32, i32
  }
  func.func @transform_6(%arg0: i32) -> (i32, i32) {
    %c0_i32 = arith.constant 0 : i32
    %c0_i32_0 = arith.constant 0 : i32
    %c0_i32_1 = arith.constant 0 : i32
    return %c0_i32, %c0_i32_0 : i32, i32
  }
  func.func @transform_7(%arg0: i32) -> (i32, i32) {
    %c0_i32 = arith.constant 0 : i32
    %c0_i32_0 = arith.constant 0 : i32
    %c0_i32_1 = arith.constant 0 : i32
    return %c0_i32, %c0_i32_0 : i32, i32
  }
  func.func @transform_8(%arg0: i32) -> (i32, i32) {
    %c0_i32 = arith.constant 0 : i32
    %c0_i32_0 = arith.constant 0 : i32
    %c0_i32_1 = arith.constant 0 : i32
    return %c0_i32, %c0_i32_0 : i32, i32
  }
  func.func @transform_9(%arg0: i32) -> (i32, i32) {
    %c0_i32 = arith.constant 0 : i32
    %c0_i32_0 = arith.constant 0 : i32
    %c0_i32_1 = arith.constant 0 : i32
    return %c0_i32, %c0_i32_0 : i32, i32
  }
  func.func @transform_10(%arg0: i32) -> (i32, i32) {
    %c0_i32 = arith.constant 0 : i32
    %c0_i32_0 = arith.constant 0 : i32
    %c0_i32_1 = arith.constant 0 : i32
    return %c0_i32, %c0_i32_0 : i32, i32
  }
  func.func @transform_11(%arg0: i32) -> (i32, i32) {
    %c0_i32 = arith.constant 0 : i32
    %c0_i32_0 = arith.constant 0 : i32
    %c0_i32_1 = arith.constant 0 : i32
    return %c0_i32, %c0_i32_0 : i32, i32
  }
  func.func @transform_12(%arg0: i32) -> (i32, i32) {
    %c0_i32 = arith.constant 0 : i32
    %c0_i32_0 = arith.constant 0 : i32
    %c0_i32_1 = arith.constant 0 : i32
    return %c0_i32, %c0_i32_0 : i32, i32
  }
  func.func @transform_13(%arg0: i32) -> (i32, i32, i32) {
    %c0_i32 = arith.constant 0 : i32
    %c0_i32_0 = arith.constant 0 : i32
    %c0_i32_1 = arith.constant 0 : i32
    return %arg0, %c0_i32, %c0_i32_0 : i32, i32, i32
  }
}

</mosaic_0001>

<bundles_post_ra>
// kernel: tpu_custom_call.1
= control target key start
LH: loop header
LB: loop body
LE: loop exit
PB: predicated region body
PF: predicated region fallthrough
CT: control target
= control target key end

     0   :  { %s1253_s0 = inlined_call_operand.vmem [shape: f32[1,8,24], index: 0, kind: input, shape index: {}]   ;;  %s1254_s1 = inlined_call_operand.vmem [shape: f32[1,8,2], index: 1, kind: input, shape index: {}]   ;;  %s1255_s2 = inlined_call_operand.hbm [shape: f32[1,24], index: 2, kind: input, shape index: {}]   ;;  %s1256_s3 = inlined_call_operand.hbm [shape: f32[1,24], index: 3, kind: input, shape index: {}]   ;;  %s1257_s4 = inlined_call_operand.hbm [shape: bf16[24,256], index: 4, kind: input, shape index: {}]   ;;  %s1258_s5 = inlined_call_operand.vmem [shape: f32[1,256], index: 5, kind: input, shape index: {}]   ;;  %s1259_s6 = inlined_call_operand.hbm [shape: bf16[256,256], index: 6, kind: input, shape index: {}]   ;;  %s1260_s7 = inlined_call_operand.vmem [shape: f32[2,256], index: 7, kind: input, shape index: {}]   ;;  %s1261_s8 = inlined_call_operand.vmem [shape: f32[1,256], index: 8, kind: input, shape index: {}]   ;;  %s1262_s9 = inlined_call_operand.hbm [shape: bf16[256,128], index: 9, kind: input, shape index: {}]   ;;  %s1263_s10 = inlined_call_operand.vmem [shape: f32[1,128], index: 10, kind: input, shape index: {}]   ;;  %s1264_s11 = inlined_call_operand.vmem [shape: f32[1,128], index: 11, kind: input, shape index: {}]   ;;  %s1265_s12 = inlined_call_operand.<no memory space> [shape: f32[1,1], index: 12, kind: input, shape index: {}]   ;;  %s1266_s13 = inlined_call_operand.vmem [shape: f32[1,8,1], index: 13, kind: output, shape index: {}]  }
   0x1   :  { %v18_v0 = vstv %s1265_s12 }
   0x2   :  { %19 = vst [vmem:[#allocation2] sm:$0x1] %v18_v0 }
   0x3   :  { %20 = vsyncpa [#allocation4], 0 }
   0x4   :  { %21 = vsyncpa [#allocation6], 0  ;;  %s43_s29 = sshll.u32 %s1256_s3, 4  ;;  %s44_s29 = int_to_ptr.hbm [resolvable:$true] %s43_s29 }
   0x5   :  { %22 = vsyncpa [#allocation9], 0  ;;  %s1099_s30 = smov [#allocation5]   ;;  %s68_s17 = sshll.u32 %s1259_s6, 4  ;;  %s69_s17 = int_to_ptr.hbm [resolvable:$true] %s68_s17 }
   0x6   :  { %s45_s14 = sshll.u32 %s1099_s30, 4  ;;  %s1100_s18 = smov [#allocation8]   ;;  %s46_s14 = int_to_ptr.vmem [resolvable:$true] %s45_s14 }
   0x7   :  { %48 = dma.hbm_to_vmem [thread:$0]  %s44_s29, 16, %s46_s14, [#allocation6]  }
   0x8   :  { %s70_s12 = sshll.u32 %s1100_s18, 4  ;;  %s32_s21 = sshll.u32 %s1255_s2, 4  ;;  %s71_s12 = int_to_ptr.vmem [resolvable:$true] %s70_s12  ;;  %s33_s21 = int_to_ptr.hbm [resolvable:$true] %s32_s21 }
   0x9   :  { %s1101_s3 = smov 128   ;;  %s1102_s22 = smov 8  }
   0xa   :  { %76 = dma.hbm_to_vmem [thread:$0]  %s69_s17, 4096, %s71_s12, [#allocation9], %s1101_s3, %s1101_s3, %s1102_s22  }
   0xb   :  { %s53_s25 = sshll.u32 %s1257_s4, 4  ;;  %s1103_s26 = smov [#allocation3]   ;;  %s54_s25 = int_to_ptr.hbm [resolvable:$true] %s53_s25 }
   0xc   :  { %s34_s27 = sshll.u32 %s1103_s26, 4  ;;  %s1104_s6 = smov [#allocation7]   ;;  %s35_s27 = int_to_ptr.vmem [resolvable:$true] %s34_s27 }
   0xd   :  { %37 = dma.hbm_to_vmem [thread:$0]  %s33_s21, 16, %s35_s27, [#allocation4]  }
   0xe   :  { %s55_s28 = sshll.u32 %s1104_s6, 4  ;;  %s85_s2 = sshll.u32 %s1262_s9, 4  ;;  %s56_s28 = int_to_ptr.vmem [resolvable:$true] %s55_s28  ;;  %s86_s2 = int_to_ptr.hbm [resolvable:$true] %s85_s2 }
   0xf   :  { %61 = dma.hbm_to_vmem [thread:$0]  %s54_s25, 384, %s56_s28, [#allocation6], %s1101_s3, %s1101_s3, %s1102_s22  }
  0x10   :  { %s1105_s14 = smov [#allocation10]   ;;  %s1106_s16 = smov 64  }
  0x11   :  { %s87_s15 = sshll.u32 %s1105_s14, 4  ;;  %s1107_s17 = smov 4   ;;  %s88_s15 = int_to_ptr.vmem [resolvable:$true] %s87_s15 }
  0x12   :  { %93 = dma.hbm_to_vmem [thread:$0]  %s86_s2, 2048, %s88_s15, [#allocation9], %s1106_s16, %s1106_s16, %s1107_s17  }
  0x13   :  { %1093 = dma.done.wait [#allocation4], 16  }
  0x14   :  { %1094 = vsyncadd [#allocation4], 4294967280 }
  0x15   :  { %1095 = dma.done.wait [#allocation6], 400  }
  0x16   :  { %1096 = vsyncadd [#allocation6], 4294966896 }
  0x17   :  { %1097 = dma.done.wait [#allocation9], 6144  }
  0x18   :  { %1098 = vsyncadd [#allocation9], 4294961152  ;;  %vm122_vm0 = vcmask 195584   ;;  %v171_v1 = vld [vmem:[#allocation7 + $0x10] sm:$0xff]  ;;  %v704_v4 = vld [vmem:[#allocation7] sm:$0xf] }
  0x19   :  { %v185_v2 = vunpack.c.l.b16 %v171_v1  ;;  %v186_v3 = vunpack.c.h.b16 %v171_v1  ;;  %v906_v5 = vld [vmem:[#allocation7 + $0x4] sm:$0xf0]  ;;  %v905_v6 = vld [vmem:[#allocation7 + $0x4] sm:$0xf]  ;;  %v1201_v7 = vld [vmem:[%s1253_s0] sm:$0xff]  ;;  %vm196_vm1 = vcmask 1043456  }
  0x1a   :  { %v706_v8 = vld [vmem:[#allocation7 + $0x8] sm:$0xf0]  ;;  %v123_v9 = vsel %vm122_vm0, %v1201_v7, 0.0  ;;  %v131_v10 = vmul.f32 %v1201_v7, %v1201_v7  ;;  %v705_v19 = vor.u32 %v906_v5, %v704_v4  ;;  %v770_v36 = vld [vmem:[#allocation8 + $0x70] sm:$0xf]  ;;  %vm693_vm5 = vcmask 7168  }
  0x1b   :  { %v189_v11 = vpack.c.b16 %v185_v2, %v185_v2  ;;  %v190_v12 = vpack.c.b16 %v186_v3, %v186_v3  ;;  %v124_v13 = vrot.slane %v123_v9, 4  ;;  %v709_v20 = vor.u32 %v905_v6, %v706_v8  ;;  %v922_v37 = vld [vmem:[#allocation8 + $0x74] sm:$0xf0]  ;;  %v834_v39 = vld [vmem:[#allocation8 + $0xf0] sm:$0xf] }
  0x1c   :  { %v132_v14 = vsel %vm122_vm0, %v131_v10, 0.0  ;;  %v771_v38 = vor.u32 %v922_v37, %v770_v36  ;;  %v938_v40 = vld [vmem:[#allocation8 + $0xf4] sm:$0xf0]  ;;  %v921_v41 = vld [vmem:[#allocation8 + $0x74] sm:$0xf] }
  0x1d   :  { %v198_v15 = vsel %vm196_vm1, %v189_v11, 0  ;;  %v201_v16 = vsel %vm196_vm1, %v190_v12, 0  ;;  %v125_v17 = vadd.f32 %v124_v13, %v123_v9  ;;  %v133_v18 = vrot.slane %v132_v14, 4  ;;  %v772_v43 = vld [vmem:[#allocation8 + $0x78] sm:$0xf0] }
  0x1e   :  { %209 = vmatpush.bf16.msra.mxu0 %v198_v15  ;;  %222 = vmatpush.bf16.msra.mxu1 %v201_v16  ;;  %v835_v42 = vor.u32 %v938_v40, %v834_v39  ;;  %v937_v44 = vld [vmem:[#allocation8 + $0xf4] sm:$0xf]  ;;  %v836_v45 = vld [vmem:[#allocation8 + $0xf8] sm:$0xf0]  ;;  %v775_v46 = vor.u32 %v921_v41, %v772_v43  ;;  %v762_v48 = vld [vmem:[#allocation8 + $0x60] sm:$0xf] }
  0x1f   :  { %v126_v21 = vrot.slane %v125_v17, 2  ;;  %v134_v22 = vadd.f32 %v133_v18, %v132_v14  ;;  %433 = vmatpush.bf16.msra.mxu2 %v771_v38  ;;  %v839_v47 = vor.u32 %v937_v44, %v836_v45  ;;  %v920_v49 = vld [vmem:[#allocation8 + $0x64] sm:$0xf0]  ;;  %v826_v50 = vld [vmem:[#allocation8 + $0xe0] sm:$0xf] }
  0x20   :  { %446 = vmatpush.bf16.msra.mxu3 %v835_v42  ;;  %v763_v51 = vor.u32 %v920_v49, %v762_v48  ;;  %v936_v52 = vld [vmem:[#allocation8 + $0xe4] sm:$0xf0]  ;;  %v919_v53 = vld [vmem:[#allocation8 + $0x64] sm:$0xf]  ;;  %v764_v54 = vld [vmem:[#allocation8 + $0x68] sm:$0xf0] }
  0x21   :  { %v127_v23 = vadd.f32 %v126_v21, %v125_v17  ;;  %v135_v24 = vrot.slane %v134_v22, 2  ;;  %v827_v55 = vor.u32 %v936_v52, %v826_v50  ;;  %v767_v56 = vor.u32 %v919_v53, %v764_v54  ;;  %v935_v57 = vld [vmem:[#allocation8 + $0xe4] sm:$0xf]  ;;  %v828_v58 = vld [vmem:[#allocation8 + $0xe8] sm:$0xf0] }
  0x22   :  { %210 = vmatpush.bf16.msra.mxu0 %v705_v19  ;;  %223 = vmatpush.bf16.msra.mxu1 %v709_v20  ;;  %v754_v59 = vld [vmem:[#allocation8 + $0x50] sm:$0xf]  ;;  %v831_v60 = vor.u32 %v935_v57, %v828_v58  ;;  %v918_v61 = vld [vmem:[#allocation8 + $0x54] sm:$0xf0]  ;;  %v917_v1 = vld [vmem:[#allocation8 + $0x54] sm:$0xf] }
  0x23   :  { %v128_v25 = vrot.slane %v127_v23, 1  ;;  %v136_v26 = vadd.f32 %v135_v24, %v134_v22  ;;  %v818_v62 = vld [vmem:[#allocation8 + $0xd0] sm:$0xf]  ;;  %v934_v63 = vld [vmem:[#allocation8 + $0xd4] sm:$0xf0]  ;;  %434 = vmatpush.bf16.msra.mxu2 %v763_v51  ;;  %v755_v0 = vor.u32 %v918_v61, %v754_v59 }
  0x24   :  { %v756_v2 = vld [vmem:[#allocation8 + $0x58] sm:$0xf0]  ;;  %v933_v3 = vld [vmem:[#allocation8 + $0xd4] sm:$0xf]  ;;  %447 = vmatpush.bf16.msra.mxu3 %v827_v55  ;;  %v819_v5 = vor.u32 %v934_v63, %v818_v62  ;;  %v746_v8 = vld [vmem:[#allocation8 + $0x40] sm:$0xf] }
  0x25   :  { %v129_v27 = vadd.f32 %v128_v25, %v127_v23  ;;  %v137_v28 = vrot.slane %v136_v26, 1  ;;  %v820_v6 = vld [vmem:[#allocation8 + $0xd8] sm:$0xf0]  ;;  %v916_v9 = vld [vmem:[#allocation8 + $0x44] sm:$0xf0]  ;;  %v759_v11 = vor.u32 %v917_v1, %v756_v2 }
  0x26   :  { %459 = vmatpush.bf16.msrb.mxu0 %v775_v46  ;;  %472 = vmatpush.bf16.msrb.mxu1 %v839_v47  ;;  %v823_v12 = vor.u32 %v933_v3, %v820_v6  ;;  %v810_v13 = vld [vmem:[#allocation8 + $0xc0] sm:$0xf]  ;;  %v932_v14 = vld [vmem:[#allocation8 + $0xc4] sm:$0xf0]  ;;  %v915_v15 = vld [vmem:[#allocation8 + $0x44] sm:$0xf]  ;;  %v747_v19 = vor.u32 %v916_v9, %v746_v8 }
  0x27   :  { %v1208_v29 = vmul.f32 0.125, %v129_v27  ;;  %v138_v30 = vadd.f32 %v137_v28, %v136_v26  ;;  %v748_v16 = vld [vmem:[#allocation8 + $0x48] sm:$0xf0]  ;;  %v931_v17 = vld [vmem:[#allocation8 + $0xc4] sm:$0xf]  ;;  %435 = vmatpush.bf16.msra.mxu2 %v755_v0  ;;  %v811_v21 = vor.u32 %v932_v14, %v810_v13 }
  0x28   :  { %v812_v20 = vld [vmem:[#allocation8 + $0xc8] sm:$0xf0]  ;;  %448 = vmatpush.bf16.msra.mxu3 %v819_v5  ;;  %v738_v22 = vld [vmem:[#allocation8 + $0x30] sm:$0xf]  ;;  %v914_v23 = vld [vmem:[#allocation8 + $0x34] sm:$0xf0]  ;;  %v751_v26 = vor.u32 %v915_v15, %v748_v16 }
  0x29   :  { %v139_v31 = vmul.f32 0.125, %v138_v30  ;;  %v140_v32 = vmul.f32 %v1208_v29, %v1208_v29  ;;  %v802_v24 = vld [vmem:[#allocation8 + $0xb0] sm:$0xf]  ;;  %v815_v27 = vor.u32 %v931_v17, %v812_v20  ;;  %v930_v28 = vld [vmem:[#allocation8 + $0xb4] sm:$0xf0]  ;;  %v739_v37 = vor.u32 %v914_v23, %v738_v22  ;;  %v167_v23 = vld [vmem:[%s1254_s1] sm:$0xff] }
  0x2a   :  { %460 = vmatpush.bf16.msrb.mxu0 %v767_v56  ;;  %473 = vmatpush.bf16.msrb.mxu1 %v831_v60  ;;  %v913_v30 = vld [vmem:[#allocation8 + $0x34] sm:$0xf]  ;;  %v803_v39 = vor.u32 %v930_v28, %v802_v24  ;;  %v730_v40 = vld [vmem:[#allocation8 + $0x20] sm:$0xf]  ;;  %v912_v41 = vld [vmem:[#allocation8 + $0x24] sm:$0xf0] }
  0x2b   :  { %v141_v33 = vsub.f32 %v139_v31, %v140_v32  ;;  %v740_v31 = vld [vmem:[#allocation8 + $0x38] sm:$0xf0]  ;;  %v929_v32 = vld [vmem:[#allocation8 + $0xb4] sm:$0xf]  ;;  %436 = vmatpush.bf16.msra.mxu2 %v747_v19  ;;  %v794_v45 = vld [vmem:[#allocation8 + $0xa0] sm:$0xf]  ;;  %v731_v51 = vor.u32 %v912_v41, %v730_v40 }
  0x2c   :  { %449 = vmatpush.bf16.msra.mxu3 %v811_v21  ;;  %v743_v43 = vor.u32 %v913_v30, %v740_v31  ;;  %v928_v46 = vld [vmem:[#allocation8 + $0xa4] sm:$0xf0]  ;;  %v911_v47 = vld [vmem:[#allocation8 + $0x24] sm:$0xf]  ;;  %v732_v48 = vld [vmem:[#allocation8 + $0x28] sm:$0xf0] }
  0x2d   :  { %v142_v34 = vmax.f32 %v141_v33, 0.0  ;;  %v804_v33 = vld [vmem:[#allocation8 + $0xb8] sm:$0xf0]  ;;  %v927_v49 = vld [vmem:[#allocation8 + $0xa4] sm:$0xf]  ;;  %v795_v53 = vor.u32 %v928_v46, %v794_v45  ;;  %v735_v55 = vor.u32 %v911_v47, %v732_v48  ;;  %v945_v28 = vld [vmem:[#allocation10 + $0x30] sm:$0xff] }
  0x2e   :  { %461 = vmatpush.bf16.msrb.mxu0 %v759_v11  ;;  %474 = vmatpush.bf16.msrb.mxu1 %v823_v12  ;;  %v807_v44 = vor.u32 %v929_v32, %v804_v33  ;;  %v796_v50 = vld [vmem:[#allocation8 + $0xa8] sm:$0xf0]  ;;  %v156_v54 = vld [vmem:[#allocation5] sm:$0x1]  ;;  %v722_v0 = vld [vmem:[#allocation8 + $0x10] sm:$0xf] }
  0x2f   :  { %v1212_v35 = vadd.f32 1e-05, %v142_v34  ;;  %v143_v34 = vld [vmem:[#allocation3] sm:$0x1]  ;;  %437 = vmatpush.bf16.msra.mxu2 %v739_v37  ;;  %v799_v56 = vor.u32 %v927_v49, %v796_v50  ;;  %v910_v1 = vld [vmem:[#allocation8 + $0x14] sm:$0xf0] }
  0x30   :  { %450 = vmatpush.bf16.msra.mxu3 %v803_v39  ;;  %v723_v2 = vor.u32 %v910_v1, %v722_v0  ;;  %v786_v3 = vld [vmem:[#allocation8 + $0x90] sm:$0xf]  ;;  %v724_v6 = vld [vmem:[#allocation8 + $0x18] sm:$0xf0]  ;;  %v925_v8 = vld [vmem:[#allocation8 + $0x94] sm:$0xf] }
  0x31   :  { %971 = vrsqrt.f32 %v1212_v35  ;;  %vm151_vm2 = vweird.f32 %v1212_v35  ;;  %v714_v11 = vld [vmem:[#allocation8] sm:$0xf]  ;;  %v908_v12 = vld [vmem:[#allocation8 + $0x4] sm:$0xf0]  ;;  %v907_v16 = vld [vmem:[#allocation8 + $0x4] sm:$0xf] }
  0x32   :  { %462 = vmatpush.bf16.msrb.mxu0 %v751_v26  ;;  %475 = vmatpush.bf16.msrb.mxu1 %v815_v27  ;;  %v778_v13 = vld [vmem:[#allocation8 + $0x80] sm:$0xf]  ;;  %v715_v14 = vor.u32 %v908_v12, %v714_v11  ;;  %v924_v15 = vld [vmem:[#allocation8 + $0x84] sm:$0xf0]  ;;  %v716_v17 = vld [vmem:[#allocation8 + $0x8] sm:$0xf0] }
  0x33   :  { %438 = vmatpush.bf16.msra.mxu2 %v731_v51  ;;  %v719_v19 = vor.u32 %v907_v16, %v716_v17  ;;  %v923_v20 = vld [vmem:[#allocation8 + $0x84] sm:$0xf]  ;;  %v780_v21 = vld [vmem:[#allocation8 + $0x88] sm:$0xf0]  ;;  %v954_v24 = vld [vmem:[#allocation10 + $0x78] sm:$0xff]  ;;  %v1109_v31 = vmov 1  }
  0x34   :  { %451 = vmatpush.bf16.msra.mxu3 %v795_v53  ;;  %v783_v22 = vor.u32 %v923_v20, %v780_v21  ;;  %v946_v26 = vld [vmem:[#allocation10 + $0x38] sm:$0xff]  ;;  %v953_v27 = vld [vmem:[#allocation10 + $0x70] sm:$0xff]  ;;  %v952_v30 = vld [vmem:[#allocation10 + $0x68] sm:$0xff] }
  0x35   :  { %v951_v32 = vld [vmem:[#allocation10 + $0x60] sm:$0xff]  ;;  %v944_v49 = vld [vmem:[#allocation10 + $0x28] sm:$0xff]  ;;  %v950_v50 = vld [vmem:[#allocation10 + $0x58] sm:$0xff] }
  0x36   :  { %463 = vmatpush.bf16.msrb.mxu0 %v743_v43  ;;  %476 = vmatpush.bf16.msrb.mxu1 %v807_v44  ;;  %v172_v33 = vld [vmem:[%s1258_s5] sm:$0x3]  ;;  %v949_v51 = vld [vmem:[#allocation10 + $0x50] sm:$0xff]  ;;  %v948_v53 = vld [vmem:[#allocation10 + $0x48] sm:$0xff] }
  0x37   :  { %v972_v4 = vpop.eup %971  ;;  %439 = vmatpush.bf16.msra.mxu2 %v723_v2 }
  0x38   :  { %v146_v10 = vmul.f32 %v972_v4, %v1212_v35  ;;  %vm152_vm3 = vweird.f32 %v972_v4 }
  0x39   :  { %vm1219_vm4 = vmor %vm151_vm2, %vm152_vm3 }
  0x3a   :  { %v147_v18 = vmul.f32 %v972_v4, %v146_v10  ;;  %464 = vmatpush.bf16.msrb.mxu0 %v735_v55  ;;  %477 = vmatpush.bf16.msrb.mxu1 %v799_v56  ;;  %v947_v55 = vld [vmem:[#allocation10 + $0x40] sm:$0xff]  ;;  %v940_v56 = vld [vmem:[#allocation10 + $0x8] sm:$0xff] }
  0x3b   :  { %440 = vmatpush.bf16.msra.mxu2 %v715_v14 }
  0x3c   :  { %v148_v25 = vmul.f32 0.5, %v147_v18  ;;  %v779_v18 = vor.u32 %v924_v15, %v778_v13 }
  0x3e   :  { %v149_v36 = vsub.f32 1.5, %v148_v25  ;;  %v1108_v25 = vmov 0  }
  0x3f   :  { %966 = vset.pattern.permute.xlu0 %v1108_v25  ;;  %653 = vmatpush.bf16.msrb.mxu2 %v946_v26 }
  0x40   :  { %v150_v42 = vmul.f32 %v972_v4, %v149_v36  ;;  %488 = vperm.xlu0 %966, %v167_v23   ;;  %v175_v36 = vperm.slane %v172_v33, 1 }
  0x42   :  { %v154_v35 = vsel %vm1219_vm4, %v972_v4, %v150_v42  ;;  %v909_v4 = vld [vmem:[#allocation8 + $0x14] sm:$0xf] }
  0x43   :  { %v155_v52 = vmul.f32 %v154_v35, %v143_v34  ;;  %v727_v9 = vor.u32 %v909_v4, %v724_v6  ;;  %654 = vmatpush.bf16.msrb.mxu2 %v945_v28  ;;  %v174_v34 = vperm.slane %v172_v33, 0  ;;  %v943_v35 = vld [vmem:[#allocation10 + $0x20] sm:$0xff] }
  0x45   :  { %v157_v57 = vmul.f32 %v155_v52, %v1208_v29  ;;  %v160_v58 = vperm.slane %v155_v52, 0  ;;  %v926_v29 = vld [vmem:[#allocation8 + $0x94] sm:$0xf0]  ;;  %465 = vmatpush.bf16.msrb.mxu0 %v727_v9 }
  0x46   :  { %v787_v5 = vor.u32 %v926_v29, %v786_v3  ;;  %v942_v52 = vld [vmem:[#allocation10 + $0x18] sm:$0xff] }
  0x47   :  { %v158_v59 = vsub.f32 %v156_v54, %v157_v57  ;;  %v162_v60 = vmul.f32 %v160_v58, %v1201_v7  ;;  %v788_v7 = vld [vmem:[#allocation8 + $0x98] sm:$0xf0]  ;;  %655 = vmatpush.bf16.msrb.mxu2 %v944_v49  ;;  %v941_v54 = vld [vmem:[#allocation10 + $0x10] sm:$0xff]  ;;  %v939_v57 = vld [vmem:[#allocation10] sm:$0xff] }
  0x48   :  { %v791_v10 = vor.u32 %v925_v8, %v788_v7  ;;  %452 = vmatpush.bf16.msra.mxu3 %v787_v5  ;;  %967 = vset.pattern.permute.xlu0 %v1109_v31 }
  0x49   :  { %v164_v61 = vperm.slane %v158_v59, 0  ;;  %466 = vmatpush.bf16.msrb.mxu0 %v719_v19  ;;  %503 = vperm.xlu0 %967, %v167_v23   ;;  %v485_v59 = vld [vmem:[%s1260_s7] ss:$2 sm:$0x3] }
  0x4a   :  { %478 = vmatpush.bf16.msrb.mxu1 %v791_v10  ;;  %v492_v7 = vperm.slane %v485_v59, 0 }
  0x4b   :  { %v166_v62 = vadd.f32 %v164_v61, %v162_v60  ;;  %656 = vmatpush.bf16.msrb.mxu2 %v943_v35  ;;  %v267_v60 = vld [vmem:[%s1261_s8] sm:$0x3] }
  0x4c   :  { %453 = vmatpush.bf16.msra.mxu3 %v779_v18  ;;  %v840_v61 = vld [vmem:[%s1260_s7 + $0x1] ss:$2 sm:$0x3]  ;;  %v269_v5 = vperm.slane %v267_v60, 0 }
  0x4d   :  { %v168_v63 = vpack.c.bf16 %v166_v62, %v166_v62  ;;  %v493_v62 = vperm.slane %v485_v59, 1  ;;  %v508_v0 = vperm.slane %v840_v61, 1  ;;  %v507_v9 = vperm.slane %v840_v61, 0 }
  0x4e   :  { %479 = vmatpush.bf16.msrb.mxu1 %v783_v22 }
  0x4f   :  { %710 = vmatmul.msk.bf16.vlgmr.msra.gmra.mxu0 %vm122_vm0, %v168_v63  ;;  %711 = vmatmul.msk.bf16.vlgmr.msra.gmra.mxu1 %vm122_vm0, %v168_v63  ;;  %v270_v63 = vperm.slane %v267_v60, 1 }
  0x50   :  { %666 = vmatpush.bf16.msrb.mxu3 %v954_v24  ;;  %657 = vmatpush.bf16.msrb.mxu2 %v942_v52 }
  0x54   :  { %667 = vmatpush.bf16.msrb.mxu3 %v953_v27  ;;  %658 = vmatpush.bf16.msrb.mxu2 %v941_v54 }
  0x58   :  { %668 = vmatpush.bf16.msrb.mxu3 %v952_v30  ;;  %659 = vmatpush.bf16.msrb.mxu2 %v940_v56 }
  0x5c   :  { %669 = vmatpush.bf16.msrb.mxu3 %v951_v32  ;;  %660 = vmatpush.bf16.msrb.mxu2 %v939_v57  ;;  %v968_v32 = vld [vmem:[%s1263_s10] ss:$0 sm:$0xff] }
  0x60   :  { %670 = vmatpush.bf16.msrb.mxu3 %v950_v50 }
  0x64   :  { %671 = vmatpush.bf16.msrb.mxu3 %v949_v51 }
  0x68   :  { %672 = vmatpush.bf16.msrb.mxu3 %v948_v53 }
  0x6c   :  { %673 = vmatpush.bf16.msrb.mxu3 %v947_v55 }
  0xb2   :  { %v489_v58 = vpop.permute.xlu0 %488 }
  0xb3   :  { %v497_v29 = vmul.f32 %v493_v62, %v489_v58  ;;  %v496_v15 = vmul.f32 %v492_v7, %v489_v58 }
  0xbb   :  { %v504_v1 = vpop.permute.xlu0 %503 }
  0xbc   :  { %v512_v8 = vmul.f32 %v508_v0, %v504_v1  ;;  %v511_v16 = vmul.f32 %v507_v9, %v504_v1 }
  0xcc   :  { %v212_v37 = vpop.f32.mrf.mxu0  ;;  %v225_v38 = vpop.f32.mrf.mxu1 }
  0xcd   :  { %v213_v39 = vadd.f32 %v212_v37, %v174_v34  ;;  %v226_v40 = vadd.f32 %v225_v38, %v175_v36 }
  0xcf   :  { %v229_v41 = vmul.f32 0.01, %v213_v39  ;;  %v230_v42 = vmul.f32 0.01, %v226_v40 }
  0xd1   :  { %v231_v43 = vmax.f32 %v213_v39, %v229_v41  ;;  %v232_v44 = vmax.f32 %v226_v40, %v230_v42  ;;  %v969_v39 = vld [vmem:[%s1264_s11] ss:$0 sm:$0xff] }
  0xd3   :  { %v233_v45 = vpack.c.bf16 %v231_v43, %v231_v43  ;;  %v234_v46 = vpack.c.bf16 %v232_v44, %v232_v44  ;;  %v970_v43 = vld [vmem:[#allocation2] ss:$0 sm:$0xff] }
  0xd4   :  { %v214_v47 = vpop.f32.mrf.mxu0  ;;  %v227_v48 = vpop.f32.mrf.mxu1 }
  0xd5   :  { %441 = vmatmul.bf16.vlgmr.msra.gmra.mxu2 %v233_v45  ;;  %454 = vmatmul.bf16.vlgmr.msra.gmra.mxu3 %v234_v46 }
  0xd6   :  { %467 = vmatmul.bf16.vlgmr.msrb.gmra.mxu0 %v233_v45  ;;  %480 = vmatmul.bf16.vlgmr.msrb.gmra.mxu1 %v234_v46 }
 0x153   :  { %v468_v2 = vpop.f32.mrf.mxu0  ;;  %v481_v3 = vpop.f32.mrf.mxu1 }
 0x154   :  { %v469_v4 = vadd.f32 %v468_v2, %v270_v63 }
 0x156   :  { %v482_v6 = vadd.f32 %v481_v3, %v469_v4 }
 0x158   :  { %v499_v10 = vadd.f32 %v497_v29, %v482_v6  ;;  %v442_v11 = vpop.f32.mrf.mxu2  ;;  %v455_v12 = vpop.f32.mrf.mxu3 }
 0x159   :  { %v443_v13 = vadd.f32 %v442_v11, %v269_v5 }
 0x15a   :  { %v514_v14 = vadd.f32 %v512_v8, %v499_v10 }
 0x15b   :  { %v456_v17 = vadd.f32 %v455_v12, %v443_v13  ;;  %v470_v18 = vpop.f32.mrf.mxu0  ;;  %v483_v19 = vpop.f32.mrf.mxu1 }
 0x15c   :  { %v516_v20 = vmul.f32 0.01, %v514_v14 }
 0x15d   :  { %v498_v21 = vadd.f32 %v496_v15, %v456_v17 }
 0x15e   :  { %v518_v22 = vmax.f32 %v514_v14, %v516_v20 }
 0x15f   :  { %v513_v23 = vadd.f32 %v511_v16, %v498_v21 }
 0x160   :  { %v444_v24 = vpop.f32.mrf.mxu2  ;;  %v457_v25 = vpop.f32.mrf.mxu3  ;;  %v520_v26 = vpack.c.bf16 %v518_v22, %v518_v22 }
 0x161   :  { %v515_v27 = vmul.f32 0.01, %v513_v23 }
 0x162   :  { %674 = vmatmul.bf16.vlgmr.msrb.gmra.mxu3 %v520_v26 }
 0x163   :  { %v517_v28 = vmax.f32 %v513_v23, %v515_v27 }
 0x165   :  { %v519_v30 = vpack.c.bf16 %v517_v28, %v517_v28 }
 0x167   :  { %661 = vmatmul.bf16.vlgmr.msrb.gmra.mxu2 %v519_v30 }
 0x1e5   :  { %v675_v31 = vpop.f32.mrf.mxu3 }
 0x1ea   :  { %v662_v33 = vpop.f32.mrf.mxu2 }
 0x1eb   :  { %v663_v34 = vadd.f32 %v968_v32, %v662_v33 }
 0x1ed   :  { %v676_v36 = vadd.f32 %v675_v31, %v663_v34  ;;  %v677_v37 = vpop.f32.mrf.mxu3 }
 0x1ef   :  { %v679_v38 = vmul.f32 0.01, %v676_v36 }
 0x1f1   :  { %v680_v40 = vmax.f32 %v676_v36, %v679_v38 }
 0x1f2   :  { %v664_v41 = vpop.f32.mrf.mxu2 }
 0x1f3   :  { %v685_v42 = vmul.f32 %v969_v39, %v680_v40 }
 0x1f5   :  { %686 = vadd.xlane.f32.xlu1 %v685_v42 }
 0x268   :  { %v687_v44 = vpop.xlane.xlu1 %686 }
 0x269   :  { %v692_v45 = vadd.f32 %v970_v43, %v687_v44 }
 0x26b   :  { %694 = vst.msk [vmem:[%s1266_s13] sm:$0xff] %vm693_vm5, %v692_v45 }
 0x26c   :  { %699 = vsyncpa [#allocation4], 1 }
 0x26d   :  { %700 = vsyncpa [#allocation6], 1 }
 0x26e   :  { %701 = vsyncpa [#allocation9], 1 }

</bundles_post_ra>
